<compile_context>
chip_gen: v7x
topology: tpu7x:2x2x1
jax: 0.10.0
libtpu: 0.0.40
codegen_flags: <defaults>
</compile_context>

<pallas_src>
import functools

import jax
import jax.numpy as jnp
from jax import lax
from jax.experimental import pallas as pl
from jax.experimental.pallas import tpu as pltpu


def _round_up(n, m):
    return ((n + m - 1) // m) * m


def _mlp_kernel(x_ref, w1_ref, b1_ref, w2_ref, b2_ref, w3_ref, b3_ref,
                w4_ref, b4_ref, o_ref, *, sub_b):
    # x_ref: [block_b, D] batch-major (as stored in HBM).
    # Sub-tile over the batch (lane) axis so each stage's live intermediate is
    # at most [hidden, sub_b] f32 (<= 16 vregs for hidden=32, sub_b=512).
    n_sub = x_ref.shape[0] // sub_b  # static
    for j in range(n_sub):
        xs = x_ref[pl.ds(j * sub_b, sub_b), :]          # [sub_b, D]
        # fc1 + relu: contract the `in` axes -> [H, sub_b] (batch on lanes),
        # no explicit transpose needed.
        h = lax.dot_general(w1_ref[...], xs,
                            dimension_numbers=(((1,), (1,)), ((), ())),
                            preferred_element_type=jnp.float32)
        h = jnp.maximum(h + b1_ref[...], 0.0)
        # fc2 + relu : [H, H] @ [H, sub_b]
        h = jnp.dot(w2_ref[...], h, preferred_element_type=jnp.float32)
        h = jnp.maximum(h + b2_ref[...], 0.0)
        # fc3 + relu
        h = jnp.dot(w3_ref[...], h, preferred_element_type=jnp.float32)
        h = jnp.maximum(h + b3_ref[...], 0.0)
        # fc4 + sigmoid : [1, H] @ [H, sub_b] -> lane-dense [1, sub_b] store.
        z = jnp.dot(w4_ref[...], h, preferred_element_type=jnp.float32) + b4_ref[...]
        # exp rides the EUP slot; exact reciprocal keeps the 1e-5 match.
        o_ref[:, pl.ds(j * sub_b, sub_b)] = pl.reciprocal(1.0 + jnp.exp(-z))


@functools.partial(jax.jit, static_argnames=("block_b",))
def neighborhood_net_forward(x, params, block_b=4096):
    """x: [B, input_dim] float32.

    params: dict with PyTorch-layout weights w{i}: [out, in], biases b{i}: [out, 1].
    Returns [B, 1] float32 (sigmoid output), matching the nn.Module forward.
    """
    assert block_b % 256 == 0, "block_b must be a multiple of 256"
    B, input_dim = x.shape
    w1, b1 = params["w1"], params["b1"]
    w2, b2 = params["w2"], params["b2"]
    w3, b3 = params["w3"], params["b3"]
    w4, b4 = params["w4"], params["b4"]

    # Clamp the block so tiny batches do not get padded to a huge tile, while
    # keeping it 256-aligned for the MXU lane tile.
    bb = min(block_b, _round_up(B, 256))
    # Inner sub-tile: 512 lanes when it divides the block, else 256.
    sub_b = 512 if bb % 512 == 0 else 256

    b_pad = _round_up(B, bb)
    num_blocks = b_pad // bb

    # Pad only when needed, along the batch axis of the original layout.
    if b_pad != B:
        x = jnp.pad(x, ((0, b_pad - B), (0, 0)))

    def rep(shape):
        # Grid-invariant (weights / biases): always block (0, 0).
        return pl.BlockSpec(shape, lambda i: (0, 0))

    kernel = functools.partial(_mlp_kernel, sub_b=sub_b)

    out = pl.pallas_call(
        kernel,
        out_shape=jax.ShapeDtypeStruct((1, b_pad), jnp.float32),
        grid_spec=pltpu.PrefetchScalarGridSpec(
            num_scalar_prefetch=0,
            grid=(num_blocks,),
            in_specs=[
                pl.BlockSpec((bb, input_dim), lambda i: (i, 0)),
                rep(w1.shape), rep(b1.shape),
                rep(w2.shape), rep(b2.shape),
                rep(w3.shape), rep(b3.shape),
                rep(w4.shape), rep(b4.shape),
            ],
            out_specs=pl.BlockSpec((1, bb), lambda i: (0, i)),
        ),
        compiler_params=pltpu.CompilerParams(
            dimension_semantics=("parallel",)),
    )(x, w1, b1, w2, b2, w3, b3, w4, b4)

    return out[0, :B].reshape(B, 1)


def init_params(key, input_dim, hidden_dim):
    """Deterministic init mimicking nn.Linear's U(-1/sqrt(fan_in), 1/sqrt(fan_in)).

    Weights are in PyTorch layout [out, in]; biases are [out, 1]."""
    dims = [(input_dim, hidden_dim),
            (hidden_dim, hidden_dim),
            (hidden_dim, hidden_dim),
            (hidden_dim, 1)]
    params = {}
    for idx, (fan_in, fan_out) in enumerate(dims, start=1):
        key, kw, kb = jax.random.split(key, 3)
        bound = 1.0 / jnp.sqrt(jnp.float32(fan_in))
        params[f"w{idx}"] = jax.random.uniform(
            kw, (fan_out, fan_in), jnp.float32, -bound, bound)
        params[f"b{idx}"] = jax.random.uniform(
            kb, (fan_out, 1), jnp.float32, -bound, bound)
    return params


def reference_forward(x, params):
    h = jax.nn.relu(x @ params["w1"].T + params["b1"][:, 0])
    h = jax.nn.relu(h @ params["w2"].T + params["b2"][:, 0])
    h = jax.nn.relu(h @ params["w3"].T + params["b3"][:, 0])
    return jax.nn.sigmoid(h @ params["w4"].T + params["b4"][:, 0])


if __name__ == "__main__":
    # Small demo shapes. block_b=512 with batch=1024 gives a 2-step parallel
    # grid (both TensorCores used on v7x); the default block_b=4096 path is
    # also exercised (auto-clamped to the batch).
    input_dim, hidden_dim, batch = 16, 32, 1024

    key = jax.random.PRNGKey(0)
    key, kx = jax.random.split(key)
    x = jax.random.normal(kx, (batch, input_dim), jnp.float32)
    params = init_params(key, input_dim, hidden_dim)
    ref = reference_forward(x, params)

    # Explicit small block (multi-step grid).
    out = jax.block_until_ready(
        neighborhood_net_forward(x, params, block_b=512))
    assert out.shape == (batch, 1)
    assert jnp.allclose(out, ref, atol=1e-5, rtol=1e-5), "mismatch vs JAX reference"

    # Default (large, auto-clamped) block.
    out_def = jax.block_until_ready(neighborhood_net_forward(x, params))
    assert jnp.allclose(out_def, ref, atol=1e-5, rtol=1e-5), "mismatch (default block)"

    # Non-divisible batch (pad-and-slice path).
    x_odd = x[:200]
    out_odd = jax.block_until_ready(
        neighborhood_net_forward(x_odd, params, block_b=512))
    assert out_odd.shape == (200, 1)
    assert jnp.allclose(out_odd, ref[:200], atol=1e-5, rtol=1e-5), "mismatch (padded batch)"

    print("KERNEL_OK")
</pallas_src>

<mosaic_0001>
module attributes {stable_mosaic.version = 11 : i64} {
  func.func @_mlp_kernel(%arg0: i32, %arg1: memref<512x16xf32, #tpu.memory_space<vmem>>, %arg2: memref<32x16xf32, #tpu.memory_space<vmem>>, %arg3: memref<32x1xf32, #tpu.memory_space<vmem>>, %arg4: memref<32x32xf32, #tpu.memory_space<vmem>>, %arg5: memref<32x1xf32, #tpu.memory_space<vmem>>, %arg6: memref<32x32xf32, #tpu.memory_space<vmem>>, %arg7: memref<32x1xf32, #tpu.memory_space<vmem>>, %arg8: memref<1x32xf32, #tpu.memory_space<vmem>>, %arg9: memref<1x1xf32, #tpu.memory_space<vmem>>, %arg10: memref<1x512xf32, #tpu.memory_space<vmem>>) attributes {dimension_semantics = [#tpu.dimension_semantics<parallel>], iteration_bounds = array<i64: 2>, scalar_prefetch = 0 : i64, scratch_operands = 0 : i64, tpu.core_type = #tpu.core_type<tc>, window_params = [{transform_indices = @transform_0, window_bounds = array<i64: 512, 16>}, {pipeline_mode = #tpu.pipeline_mode<synchronous>, transform_indices = @transform_1, window_bounds = array<i64: 32, 16>}, {pipeline_mode = #tpu.pipeline_mode<synchronous>, transform_indices = @transform_2, window_bounds = array<i64: 32, 1>}, {pipeline_mode = #tpu.pipeline_mode<synchronous>, transform_indices = @transform_3, window_bounds = array<i64: 32, 32>}, {pipeline_mode = #tpu.pipeline_mode<synchronous>, transform_indices = @transform_4, window_bounds = array<i64: 32, 1>}, {pipeline_mode = #tpu.pipeline_mode<synchronous>, transform_indices = @transform_5, window_bounds = array<i64: 32, 32>}, {pipeline_mode = #tpu.pipeline_mode<synchronous>, transform_indices = @transform_6, window_bounds = array<i64: 32, 1>}, {pipeline_mode = #tpu.pipeline_mode<synchronous>, transform_indices = @transform_7, window_bounds = array<i64: 1, 32>}, {pipeline_mode = #tpu.pipeline_mode<synchronous>, transform_indices = @transform_8, window_bounds = array<i64: 1, 1>}, {transform_indices = @transform_9, window_bounds = array<i64: 1, 512>}]} {
    %c0 = arith.constant 0 : index
    %c0_0 = arith.constant 0 : index
    %0 = vector.load %arg1[%c0, %c0_0] : memref<512x16xf32, #tpu.memory_space<vmem>>, vector<512x16xf32>
    %c0_1 = arith.constant 0 : index
    %c0_2 = arith.constant 0 : index
    %1 = vector.load %arg2[%c0_1, %c0_2] : memref<32x16xf32, #tpu.memory_space<vmem>>, vector<32x16xf32>
    %cst = arith.constant dense<0.000000e+00> : vector<32x512xf32>
    %2 = tpu.matmul %1, %0, %cst {dimension_numbers = #tpu.dot_dimension_numbers<[1], [1], [0], [0], [0, 0, 1, 0], [], []>} : vector<32x16xf32>, vector<512x16xf32>, vector<32x512xf32> -> vector<32x512xf32>
    %c0_3 = arith.constant 0 : index
    %c0_4 = arith.constant 0 : index
    %3 = vector.load %arg3[%c0_3, %c0_4] : memref<32x1xf32, #tpu.memory_space<vmem>>, vector<32x1xf32>
    %4 = vector.broadcast %3 : vector<32x1xf32> to vector<32x512xf32>
    %5 = arith.addf %2, %4 : vector<32x512xf32>
    %cst_5 = arith.constant 0.000000e+00 : f32
    %6 = vector.broadcast %cst_5 : f32 to vector<32x512xf32>
    %7 = arith.maximumf %5, %6 : vector<32x512xf32>
    %c0_6 = arith.constant 0 : index
    %c0_7 = arith.constant 0 : index
    %8 = vector.load %arg4[%c0_6, %c0_7] : memref<32x32xf32, #tpu.memory_space<vmem>>, vector<32x32xf32>
    %cst_8 = arith.constant dense<0.000000e+00> : vector<32x512xf32>
    %9 = tpu.matmul %8, %7, %cst_8 {dimension_numbers = #tpu.dot_dimension_numbers<[1], [0], [0], [1], [0, 0, 1, 1], [], []>} : vector<32x32xf32>, vector<32x512xf32>, vector<32x512xf32> -> vector<32x512xf32>
    %c0_9 = arith.constant 0 : index
    %c0_10 = arith.constant 0 : index
    %10 = vector.load %arg5[%c0_9, %c0_10] : memref<32x1xf32, #tpu.memory_space<vmem>>, vector<32x1xf32>
    %11 = vector.broadcast %10 : vector<32x1xf32> to vector<32x512xf32>
    %12 = arith.addf %9, %11 : vector<32x512xf32>
    %cst_11 = arith.constant 0.000000e+00 : f32
    %13 = vector.broadcast %cst_11 : f32 to vector<32x512xf32>
    %14 = arith.maximumf %12, %13 : vector<32x512xf32>
    %c0_12 = arith.constant 0 : index
    %c0_13 = arith.constant 0 : index
    %15 = vector.load %arg6[%c0_12, %c0_13] : memref<32x32xf32, #tpu.memory_space<vmem>>, vector<32x32xf32>
    %cst_14 = arith.constant dense<0.000000e+00> : vector<32x512xf32>
    %16 = tpu.matmul %15, %14, %cst_14 {dimension_numbers = #tpu.dot_dimension_numbers<[1], [0], [0], [1], [0, 0, 1, 1], [], []>} : vector<32x32xf32>, vector<32x512xf32>, vector<32x512xf32> -> vector<32x512xf32>
    %c0_15 = arith.constant 0 : index
    %c0_16 = arith.constant 0 : index
    %17 = vector.load %arg7[%c0_15, %c0_16] : memref<32x1xf32, #tpu.memory_space<vmem>>, vector<32x1xf32>
    %18 = vector.broadcast %17 : vector<32x1xf32> to vector<32x512xf32>
    %19 = arith.addf %16, %18 : vector<32x512xf32>
    %cst_17 = arith.constant 0.000000e+00 : f32
    %20 = vector.broadcast %cst_17 : f32 to vector<32x512xf32>
    %21 = arith.maximumf %19, %20 : vector<32x512xf32>
    %c0_18 = arith.constant 0 : index
    %c0_19 = arith.constant 0 : index
    %22 = vector.load %arg8[%c0_18, %c0_19] : memref<1x32xf32, #tpu.memory_space<vmem>>, vector<1x32xf32>
    %cst_20 = arith.constant dense<0.000000e+00> : vector<1x512xf32>
    %23 = tpu.matmul %22, %21, %cst_20 {dimension_numbers = #tpu.dot_dimension_numbers<[1], [0], [0], [1], [0, 0, 1, 1], [], []>} : vector<1x32xf32>, vector<32x512xf32>, vector<1x512xf32> -> vector<1x512xf32>
    %c0_21 = arith.constant 0 : index
    %c0_22 = arith.constant 0 : index
    %24 = vector.load %arg9[%c0_21, %c0_22] : memref<1x1xf32, #tpu.memory_space<vmem>>, vector<1x1xf32>
    %25 = vector.broadcast %24 : vector<1x1xf32> to vector<1x512xf32>
    %26 = arith.addf %23, %25 : vector<1x512xf32>
    %cst_23 = arith.constant 0.000000e+00 : f32
    %27 = vector.broadcast %cst_23 : f32 to vector<1x512xf32>
    %28 = arith.subf %27, %26 : vector<1x512xf32>
    %29 = math.exp %28 : vector<1x512xf32>
    %cst_24 = arith.constant 1.000000e+00 : f32
    %30 = vector.broadcast %cst_24 : f32 to vector<1x512xf32>
    %31 = arith.addf %30, %29 : vector<1x512xf32>
    %32 = tpu.reciprocal %31 : vector<1x512xf32> -> vector<1x512xf32>
    %c0_25 = arith.constant 0 : index
    %c0_26 = arith.constant 0 : index
    %33 = vector.load %arg10[%c0_25, %c0_26] : memref<1x512xf32, #tpu.memory_space<vmem>>, vector<1x512xf32>
    tpu.vector_store %arg10[%c0_25, %c0_26], %32 {strides = array<i32>} : memref<1x512xf32, #tpu.memory_space<vmem>>, vector<1x512xf32>,
    return
  }
  func.func @transform_0(%arg0: i32) -> (i32, i32) {
    %c0_i32 = arith.constant 0 : i32
    %c0_i32_0 = arith.constant 0 : i32
    return %arg0, %c0_i32 : i32, i32
  }
  func.func @transform_1(%arg0: i32) -> (i32, i32) {
    %c0_i32 = arith.constant 0 : i32
    %c0_i32_0 = arith.constant 0 : i32
    %c0_i32_1 = arith.constant 0 : i32
    return %c0_i32, %c0_i32_0 : i32, i32
  }
  func.func @transform_2(%arg0: i32) -> (i32, i32) {
    %c0_i32 = arith.constant 0 : i32
    %c0_i32_0 = arith.constant 0 : i32
    %c0_i32_1 = arith.constant 0 : i32
    return %c0_i32, %c0_i32_0 : i32, i32
  }
  func.func @transform_3(%arg0: i32) -> (i32, i32) {
    %c0_i32 = arith.constant 0 : i32
    %c0_i32_0 = arith.constant 0 : i32
    %c0_i32_1 = arith.constant 0 : i32
    return %c0_i32, %c0_i32_0 : i32, i32
  }
  func.func @transform_4(%arg0: i32) -> (i32, i32) {
    %c0_i32 = arith.constant 0 : i32
    %c0_i32_0 = arith.constant 0 : i32
    %c0_i32_1 = arith.constant 0 : i32
    return %c0_i32, %c0_i32_0 : i32, i32
  }
  func.func @transform_5(%arg0: i32) -> (i32, i32) {
    %c0_i32 = arith.constant 0 : i32
    %c0_i32_0 = arith.constant 0 : i32
    %c0_i32_1 = arith.constant 0 : i32
    return %c0_i32, %c0_i32_0 : i32, i32
  }
  func.func @transform_6(%arg0: i32) -> (i32, i32) {
    %c0_i32 = arith.constant 0 : i32
    %c0_i32_0 = arith.constant 0 : i32
    %c0_i32_1 = arith.constant 0 : i32
    return %c0_i32, %c0_i32_0 : i32, i32
  }
  func.func @transform_7(%arg0: i32) -> (i32, i32) {
    %c0_i32 = arith.constant 0 : i32
    %c0_i32_0 = arith.constant 0 : i32
    %c0_i32_1 = arith.constant 0 : i32
    return %c0_i32, %c0_i32_0 : i32, i32
  }
  func.func @transform_8(%arg0: i32) -> (i32, i32) {
    %c0_i32 = arith.constant 0 : i32
    %c0_i32_0 = arith.constant 0 : i32
    %c0_i32_1 = arith.constant 0 : i32
    return %c0_i32, %c0_i32_0 : i32, i32
  }
  func.func @transform_9(%arg0: i32) -> (i32, i32) {
    %c0_i32 = arith.constant 0 : i32
    %c0_i32_0 = arith.constant 0 : i32
    return %c0_i32, %arg0 : i32, i32
  }
}

</mosaic_0001>

<bundles_post_ra>
// kernel: neighborhood_net_forward.1
= control target key start
LH: loop header
LB: loop body
LE: loop exit
PB: predicated region body
PF: predicated region fallthrough
CT: control target
= control target key end

     0   :  { %s2456_s0 = inlined_call_operand.vmem [shape: f32[1024,16], index: 0, kind: input, shape index: {}]   ;;  %s2457_s1 = inlined_call_operand.vmem [shape: f32[32,16], index: 1, kind: input, shape index: {}]   ;;  %s2458_s2 = inlined_call_operand.vmem [shape: f32[32,1], index: 2, kind: input, shape index: {}]   ;;  %s2459_s3 = inlined_call_operand.vmem [shape: f32[32,32], index: 3, kind: input, shape index: {}]   ;;  %s2460_s4 = inlined_call_operand.vmem [shape: f32[32,1], index: 4, kind: input, shape index: {}]   ;;  %s2461_s5 = inlined_call_operand.vmem [shape: f32[32,32], index: 5, kind: input, shape index: {}]   ;;  %s2462_s6 = inlined_call_operand.vmem [shape: f32[32,1], index: 6, kind: input, shape index: {}]   ;;  %s2463_s7 = inlined_call_operand.vmem [shape: f32[1,32], index: 7, kind: input, shape index: {}]   ;;  %s2464_s8 = inlined_call_operand.<no memory space> [shape: f32[1,1], index: 8, kind: input, shape index: {}]   ;;  %s2465_s9 = inlined_call_operand.hbm [shape: f32[1,1024], index: 9, kind: output, shape index: {}]  }
   0x1   :  { %v14_v0 = vstv %s2464_s8 }
   0x2   :  { %15 = vst [vmem:[#allocation2] sm:$0x1] %v14_v0 }
   0x3   :  { %16 = vsyncpa [#allocation4], 0 }
   0x4   :  { %18 = vsyncpa [#allocation4 + $0x1], 0  ;;  %s2088_s11 = smov 0   ;;  %s2090_s12 = smov 0  }
   0x5   :  { %s2092_s13 = smov 0   ;;  %s2094_s14 = smov 0  }
   0x6 LB: > { %s1579_s8 = sadd.s32 4294967295, %s2029_s14   ;;  %s1580_s15 = sadd.s32 4294967294, %s2029_s14   ;;  %s2029_s14 = sphi %s2094_s14, %s2473_s14   ;;  %s2025_s13 = sphi %s2092_s13, %s2472_s13   ;;  %s2021_s12 = sphi %s2090_s12, %s2471_s12   ;;  %s2017_s11 = sphi %s2088_s11, %s2470_s11  }
   0x7   : > { %s2111_s16 = sadd.s32 1, %s2029_s14   ;;  %s225_s17 = sadd.s32 1, %s2025_s13 }
   0x8   : > { %s222_s18 = ssub.s32 %s2029_s14, %s2111_s16  ;;  %p235_p0 = scmp.ne.s32.totalorder %s2025_s13, %s2021_s12 }
   0x9   : > { %p223_p1 = scmp.eq.s32.totalorder %s222_s18, 0  ;;  %p236_p2 = scmp.eq.s32.totalorder %s1579_s8, 1 }
   0xa   : > { %p241_p3 = scmp.ne.s32.totalorder %s2021_s12, %s2017_s11  ;;  %p242_p4 = scmp.eq.s32.totalorder %s1580_s15, 1 }
   0xb   : > { %s2121_s19 = scalar_select %p223_p1, %s2025_s13, %s225_s17  }
   0xc   : > { %p2123_p5 = por %p236_p2, %p235_p0  ;;  %p2127_p6 = por %p242_p4, %p241_p3 }
   0xd   : > { %p1583_p7 = scmp.ge.s32.totalorder %s2029_s14, 1  ;;  %p293_p8 = scmp.lt.s32.totalorder %s2029_s14, 3 }
   0xf   : > { %p294_p9 = pnand %p1583_p7, %p293_p8 }
  0x10   : > { %s2133_s22 = sshll.u32 (!%p294_p9), %s1579_s8, 6  ;;  %vm428_vm0 = vcmask (!%p294_p9), 130048   ;;  %v2138_v1 = vld [vmem:[%s2457_s1] sm:$0xff] (!%p294_p9)  ;;  %v2031_v3 = vmov (!%p294_p9), 0   ;;  %v406_v4 = vld [vmem:[%s2458_s2 + $0x10] sm:$0xff] (!%p294_p9)  ;;  %v405_v5 = vld [vmem:[%s2458_s2 + $0x8] sm:$0xff] (!%p294_p9) }
  0x11   : > { %297 = sbr.rel (%p294_p9) target bundleno = 1068 (0x42c), region = 56  ;;  %p330_p10 = scmp.lt.s32.totalorder (!%p294_p9), %s2133_s22, 127  ;;  %1715 = vmatprep.mubr.msk.f32.mxu0 (!%p294_p9), %vm428_vm0, %v2138_v1  ;;  %1755 = vmatprep.mubr.msk.f32.mxu1 (!%p294_p9), %vm428_vm0, %v2138_v1  ;;  %v404_v2 = vld [vmem:[%s2458_s2] sm:$0xff] (!%p294_p9)  ;;  %v407_v6 = vld [vmem:[%s2458_s2 + $0x18] sm:$0xff] (!%p294_p9)  ;;  %vm2165_vm1 = vmpackc.low (!%p294_p9), %vm428_vm0, %vm428_vm0  ;;  %v2032_v7 = vmov (!%p294_p9), 0.0   ;;  %vm855_vm2 = vcmask (!%p294_p9), 261120  }
  0x12   : > { %1949 = vset.pattern.permute.xlu0 (!%p294_p9), %v2031_v3  ;;  %1950 = vset.pattern.permute.xlu1 (!%p294_p9), %v2031_v3  ;;  %v831_v11 = vld [vmem:[%s2460_s4] sm:$0xff] (!%p294_p9)  ;;  %v833_v27 = vld [vmem:[%s2460_s4 + $0x10] sm:$0xff] (!%p294_p9)  ;;  %v832_v28 = vld [vmem:[%s2460_s4 + $0x8] sm:$0xff] (!%p294_p9)  ;;  %s326_s27 = sand.u32 (!%p294_p9), 1, %s2021_s12   ;;  %s2414_s8 = scalar_lea.hbm (!%p294_p9), %s2465_s9, %s2133_s22 }
  0x13   : > { %410 = vperm.xlu0 (!%p294_p9), %1949, %v404_v2   ;;  %420 = vperm.xlu1 (!%p294_p9), %1950, %v406_v4   ;;  %v834_v38 = vld [vmem:[%s2460_s4 + $0x18] sm:$0xff] (!%p294_p9)  ;;  %v1066_v42 = vld [vmem:[%s2462_s6] sm:$0xff] (!%p294_p9)  ;;  %v1067_v43 = vld [vmem:[%s2462_s6 + $0x8] sm:$0xff] (!%p294_p9)  ;;  %s1584_s28 = sshll.u32 (!%p294_p9), %s326_s27, 2  ;;  %s1507_s15 = scalar_lea.sflag (!%p294_p9), [#allocation4], %s326_s27 }
  0x14   : > { %v1068_v52 = vld [vmem:[%s2462_s6 + $0x10] sm:$0xff] (!%p294_p9)  ;;  %v1069_v54 = vld [vmem:[%s2462_s6 + $0x18] sm:$0xff] (!%p294_p9)  ;;  %v1297_v58 = vld [vmem:[#allocation2] sm:$0x1] (!%p294_p9)  ;;  %s2034_s18 = smov (!%p294_p9), [#allocation3]  }
  0x15   : > { %s1971_s23 = sshll.u32 (!%p294_p9), %s2034_s18, 4  ;;  %s1972_s23 = int_to_ptr.vmem [resolvable:$false] %s1971_s23 }
  0x16   : > { %s1973_s25 = scalar_lea.vmem (!%p294_p9), %s1972_s23, 128 }
  0x17   : > { %415 = vperm.xlu0 (!%p294_p9), %1949, %v405_v5   ;;  %425 = vperm.xlu1 (!%p294_p9), %1950, %v407_v6  }
  0x18   : > { %s331_s29 = scalar_select %p330_p10, %s2133_s22, 127 }
  0x1a   : > { %s1586_s17 = sshll.u32 %s331_s29, 3  ;;  %s328_s29 = scalar_lea.vmem [#allocation3], %s1584_s28 }
  0x1b   : > { %s2161_s24 = scalar_lea.vmem %s2456_s0, %s1586_s17  ;;  %837 = vperm.xlu0 %1949, %v831_v11   ;;  %842 = vperm.xlu1 %1950, %v832_v28   ;;  %s1521_s30 = sshll.u32 %s328_s29, 4  ;;  %s2416_s30 = int_to_ptr.vmem [resolvable:$true] %s1521_s30 }
  0x1c   : > { %v352_v8 = vld [vmem:[%s2161_s24 + $0x80] sm:$0xff]  ;;  %v353_v9 = vld [vmem:[%s2161_s24 + $0x88] sm:$0xff]  ;;  %v354_v20 = vld [vmem:[%s2161_s24 + $0x90] sm:$0xff]  ;;  %s1967_s17 = scalar_lea.vmem %s2416_s30, 64  ;;  %p1974_p0 = scmp.lt.s32.totalorder %s2416_s30, %s1972_s23 }
  0x1d   : > { %v384_v10 = vld [vmem:[%s2161_s24 + $0x180] sm:$0xff]  ;;  %v1763_v12 = vpack.c.bf16 %v353_v9, %v352_v8  ;;  %v385_v13 = vld [vmem:[%s2161_s24 + $0x188] sm:$0xff]  ;;  %v355_v22 = vld [vmem:[%s2161_s24 + $0x98] sm:$0xff]  ;;  %p1968_p11 = scmp.ne.s32.totalorder %s2416_s30, %s1967_s17  ;;  %p1975_p1 = scmp.lt.s32.totalorder %s1973_s25, %s1967_s17 }
  0x1e   : > { %v336_v14 = vld [vmem:[%s2161_s24] sm:$0xff]  ;;  %v337_v15 = vld [vmem:[%s2161_s24 + $0x8] sm:$0xff]  ;;  %v1811_v16 = vpack.c.bf16 %v385_v13, %v384_v10  ;;  %v386_v23 = vld [vmem:[%s2161_s24 + $0x190] sm:$0xff]  ;;  %v1769_v25 = vpack.c.bf16 %v355_v22, %v354_v20 }
  0x1f   : > { %v1766_v17 = vpack.c.bf16 %v337_v15, %v336_v14  ;;  %v368_v18 = vld [vmem:[%s2161_s24 + $0x100] sm:$0xff]  ;;  %v369_v19 = vld [vmem:[%s2161_s24 + $0x108] sm:$0xff]  ;;  %1765 = vmatprep.subr.msk.bf16.mxu0 %vm2165_vm1, %v1763_v12  ;;  %v387_v24 = vld [vmem:[%s2161_s24 + $0x198] sm:$0xff]  ;;  %847 = vperm.xlu0 %1949, %v833_v27   ;;  %p1969_p12 = pnand %p1968_p11, %p2123_p5  ;;  %p1976_p2 = por %p1975_p1, %p1974_p0 }
  0x20   : > { %v1814_v21 = vpack.c.bf16 %v369_v19, %v368_v18  ;;  %1813 = vmatprep.subr.msk.bf16.mxu1 %vm2165_vm1, %v1811_v16  ;;  %v1817_v26 = vpack.c.bf16 %v387_v24, %v386_v23  ;;  %v338_v29 = vld [vmem:[%s2161_s24 + $0x10] sm:$0xff]  ;;  %v339_v30 = vld [vmem:[%s2161_s24 + $0x18] sm:$0xff]  ;;  %v356_v33 = vld [vmem:[%s2161_s24 + $0xa0] sm:$0xff]  ;;  %852 = vperm.xlu1 %1950, %v834_v38  }
  0x21   : > { %1768 = vmatpush3.bf16.xpose.msk.msra.mxu0 %vm2165_vm1, %v1766_v17  ;;  %v370_v31 = vld [vmem:[%s2161_s24 + $0x110] sm:$0xff]  ;;  %v371_v32 = vld [vmem:[%s2161_s24 + $0x118] sm:$0xff]  ;;  %v357_v34 = vld [vmem:[%s2161_s24 + $0xa8] sm:$0xff]  ;;  %v1772_v37 = vpack.c.bf16 %v339_v30, %v338_v29  ;;  %p1970_p13 = pneg %p1969_p12 }
  0x22   : > { %1816 = vmatpush3.bf16.xpose.msk.msra.mxu1 %vm2165_vm1, %v1814_v21  ;;  %1771 = vmatprep.subr.msk.bf16.mxu0 %vm2165_vm1, %v1769_v25  ;;  %v388_v35 = vld [vmem:[%s2161_s24 + $0x1a0] sm:$0xff]  ;;  %v389_v36 = vld [vmem:[%s2161_s24 + $0x1a8] sm:$0xff]  ;;  %v1820_v39 = vpack.c.bf16 %v371_v32, %v370_v31  ;;  %v1775_v40 = vpack.c.bf16 %v357_v34, %v356_v33  ;;  %v358_v48 = vld [vmem:[%s2161_s24 + $0xb0] sm:$0xff] }
  0x23   : > { %1819 = vmatprep.subr.msk.bf16.mxu1 %vm2165_vm1, %v1817_v26  ;;  %v1823_v41 = vpack.c.bf16 %v389_v36, %v388_v35  ;;  %v340_v44 = vld [vmem:[%s2161_s24 + $0x20] sm:$0xff]  ;;  %v341_v45 = vld [vmem:[%s2161_s24 + $0x28] sm:$0xff]  ;;  %v359_v49 = vld [vmem:[%s2161_s24 + $0xb8] sm:$0xff]  ;;  %1072 = vperm.xlu0 %1949, %v1066_v42   ;;  %p1977_p3 = pnand %p1976_p2, %p1970_p13 }
  0x24   : > { %v372_v46 = vld [vmem:[%s2161_s24 + $0x120] sm:$0xff]  ;;  %v373_v47 = vld [vmem:[%s2161_s24 + $0x128] sm:$0xff]  ;;  %v390_v50 = vld [vmem:[%s2161_s24 + $0x1b0] sm:$0xff]  ;;  %1077 = vperm.xlu1 %1950, %v1067_v43   ;;  %v1778_v53 = vpack.c.bf16 %v341_v45, %v340_v44  ;;  %v1781_v56 = vpack.c.bf16 %v359_v49, %v358_v48 }
  0x25   : > { %v391_v51 = vld [vmem:[%s2161_s24 + $0x1b8] sm:$0xff]  ;;  %v1826_v55 = vpack.c.bf16 %v373_v47, %v372_v46  ;;  %v342_v59 = vld [vmem:[%s2161_s24 + $0x30] sm:$0xff]  ;;  %v360_v63 = vld [vmem:[%s2161_s24 + $0xc0] sm:$0xff] }
  0x26   : > { %v1829_v57 = vpack.c.bf16 %v391_v51, %v390_v50  ;;  %v343_v60 = vld [vmem:[%s2161_s24 + $0x38] sm:$0xff]  ;;  %v374_v61 = vld [vmem:[%s2161_s24 + $0x130] sm:$0xff]  ;;  %v361_v0 = vld [vmem:[%s2161_s24 + $0xc8] sm:$0xff] }
  0x27   : > { %1082 = vperm.xlu0 %1949, %v1068_v52   ;;  %v375_v62 = vld [vmem:[%s2161_s24 + $0x138] sm:$0xff]  ;;  %v392_v2 = vld [vmem:[%s2161_s24 + $0x1c0] sm:$0xff]  ;;  %v393_v3 = vld [vmem:[%s2161_s24 + $0x1c8] sm:$0xff]  ;;  %v1784_v4 = vpack.c.bf16 %v343_v60, %v342_v59  ;;  %v1787_v6 = vpack.c.bf16 %v361_v0, %v360_v63 }
  0x28   : > { %1087 = vperm.xlu1 %1950, %v1069_v54   ;;  %v1832_v5 = vpack.c.bf16 %v375_v62, %v374_v61  ;;  %v1835_v8 = vpack.c.bf16 %v393_v3, %v392_v2  ;;  %v344_v9 = vld [vmem:[%s2161_s24 + $0x40] sm:$0xff]  ;;  %v345_v10 = vld [vmem:[%s2161_s24 + $0x48] sm:$0xff]  ;;  %v362_v13 = vld [vmem:[%s2161_s24 + $0xd0] sm:$0xff] }
  0x29   : > { %1774 = vmatpush3.bf16.xpose.msk.msra.mxu0 %vm2165_vm1, %v1772_v37  ;;  %v376_v11 = vld [vmem:[%s2161_s24 + $0x140] sm:$0xff]  ;;  %v377_v12 = vld [vmem:[%s2161_s24 + $0x148] sm:$0xff]  ;;  %v363_v14 = vld [vmem:[%s2161_s24 + $0xd8] sm:$0xff]  ;;  %v1790_v17 = vpack.c.bf16 %v345_v10, %v344_v9 }
  0x2a   : > { %1822 = vmatpush3.bf16.xpose.msk.msra.mxu1 %vm2165_vm1, %v1820_v39  ;;  %1777 = vmatprep.subr.msk.bf16.mxu0 %vm2165_vm1, %v1775_v40  ;;  %v394_v15 = vld [vmem:[%s2161_s24 + $0x1d0] sm:$0xff]  ;;  %v395_v16 = vld [vmem:[%s2161_s24 + $0x1d8] sm:$0xff]  ;;  %v1838_v18 = vpack.c.bf16 %v377_v12, %v376_v11  ;;  %v1793_v19 = vpack.c.bf16 %v363_v14, %v362_v13  ;;  %v364_v25 = vld [vmem:[%s2161_s24 + $0xe0] sm:$0xff] }
  0x2b   : > { %1825 = vmatprep.subr.msk.bf16.mxu1 %vm2165_vm1, %v1823_v41  ;;  %1300 = vperm.xlu0 %1949, %v1297_v58   ;;  %v1841_v20 = vpack.c.bf16 %v395_v16, %v394_v15  ;;  %v346_v21 = vld [vmem:[%s2161_s24 + $0x50] sm:$0xff]  ;;  %v347_v22 = vld [vmem:[%s2161_s24 + $0x58] sm:$0xff]  ;;  %v365_v26 = vld [vmem:[%s2161_s24 + $0xe8] sm:$0xff] }
  0x2c   : > { %v378_v23 = vld [vmem:[%s2161_s24 + $0x150] sm:$0xff]  ;;  %v379_v24 = vld [vmem:[%s2161_s24 + $0x158] sm:$0xff]  ;;  %v396_v27 = vld [vmem:[%s2161_s24 + $0x1e0] sm:$0xff]  ;;  %v1796_v29 = vpack.c.bf16 %v347_v22, %v346_v21  ;;  %v1799_v31 = vpack.c.bf16 %v365_v26, %v364_v25 }
  0x2d   : > { %v397_v28 = vld [vmem:[%s2161_s24 + $0x1e8] sm:$0xff]  ;;  %v1844_v30 = vpack.c.bf16 %v379_v24, %v378_v23  ;;  %v348_v33 = vld [vmem:[%s2161_s24 + $0x60] sm:$0xff]  ;;  %v366_v37 = vld [vmem:[%s2161_s24 + $0xf0] sm:$0xff] }
  0x2e   : > { %v1847_v32 = vpack.c.bf16 %v397_v28, %v396_v27  ;;  %v349_v34 = vld [vmem:[%s2161_s24 + $0x68] sm:$0xff]  ;;  %v380_v35 = vld [vmem:[%s2161_s24 + $0x160] sm:$0xff]  ;;  %v367_v38 = vld [vmem:[%s2161_s24 + $0xf8] sm:$0xff] }
  0x2f   : > { %v381_v36 = vld [vmem:[%s2161_s24 + $0x168] sm:$0xff]  ;;  %v398_v39 = vld [vmem:[%s2161_s24 + $0x1f0] sm:$0xff]  ;;  %v399_v40 = vld [vmem:[%s2161_s24 + $0x1f8] sm:$0xff]  ;;  %v1802_v41 = vpack.c.bf16 %v349_v34, %v348_v33  ;;  %v1805_v43 = vpack.c.bf16 %v367_v38, %v366_v37 }
  0x30   : > { %v1850_v42 = vpack.c.bf16 %v381_v36, %v380_v35  ;;  %v1853_v44 = vpack.c.bf16 %v399_v40, %v398_v39  ;;  %v350_v45 = vld [vmem:[%s2161_s24 + $0x70] sm:$0xff]  ;;  %v351_v46 = vld [vmem:[%s2161_s24 + $0x78] sm:$0xff]  ;;  %v401_v51 = vld [vmem:[%s2457_s1 + $0x8] sm:$0xff] }
  0x31   : > { %1780 = vmatpush3.bf16.xpose.msk.msra.mxu0 %vm2165_vm1, %v1778_v53  ;;  %v382_v47 = vld [vmem:[%s2161_s24 + $0x170] sm:$0xff]  ;;  %v383_v48 = vld [vmem:[%s2161_s24 + $0x178] sm:$0xff]  ;;  %v1808_v49 = vpack.c.bf16 %v351_v46, %v350_v45 }
  0x32   : > { %1828 = vmatpush3.bf16.xpose.msk.msra.mxu1 %vm2165_vm1, %v1826_v55  ;;  %1783 = vmatprep.subr.msk.bf16.mxu0 %vm2165_vm1, %v1781_v56  ;;  %v1856_v50 = vpack.c.bf16 %v383_v48, %v382_v47  ;;  %v402_v52 = vld [vmem:[%s2457_s1 + $0x10] sm:$0xff] }
  0x33   : > { %1831 = vmatprep.subr.msk.bf16.mxu1 %vm2165_vm1, %v1829_v57 }
  0x39   : > { %1786 = vmatpush3.bf16.xpose.msk.msra.mxu0 %vm2165_vm1, %v1784_v4 }
  0x3a   : > { %1834 = vmatpush3.bf16.xpose.msk.msra.mxu1 %vm2165_vm1, %v1832_v5  ;;  %1789 = vmatprep.subr.msk.bf16.mxu0 %vm2165_vm1, %v1787_v6 }
  0x3b   : > { %1837 = vmatprep.subr.msk.bf16.mxu1 %vm2165_vm1, %v1835_v8 }
  0x41   : > { %1792 = vmatpush3.bf16.xpose.msk.msra.mxu0 %vm2165_vm1, %v1790_v17 }
  0x42   : > { %1840 = vmatpush3.bf16.xpose.msk.msra.mxu1 %vm2165_vm1, %v1838_v18  ;;  %1795 = vmatprep.subr.msk.bf16.mxu0 %vm2165_vm1, %v1793_v19 }
  0x43   : > { %1843 = vmatprep.subr.msk.bf16.mxu1 %vm2165_vm1, %v1841_v20 }
  0x49   : > { %1798 = vmatpush3.bf16.xpose.msk.msra.mxu0 %vm2165_vm1, %v1796_v29 }
  0x4a   : > { %1846 = vmatpush3.bf16.xpose.msk.msra.mxu1 %vm2165_vm1, %v1844_v30  ;;  %1801 = vmatprep.subr.msk.bf16.mxu0 %vm2165_vm1, %v1799_v31 }
  0x4b   : > { %1849 = vmatprep.subr.msk.bf16.mxu1 %vm2165_vm1, %v1847_v32 }
  0x51   : > { %1804 = vmatpush3.bf16.xpose.msk.msra.mxu0 %vm2165_vm1, %v1802_v41 }
  0x52   : > { %1852 = vmatpush3.bf16.xpose.msk.msra.mxu1 %vm2165_vm1, %v1850_v42  ;;  %1807 = vmatprep.subr.msk.bf16.mxu0 %vm2165_vm1, %v1805_v43 }
  0x53   : > { %1855 = vmatprep.subr.msk.bf16.mxu1 %vm2165_vm1, %v1853_v44 }
  0x59   : > { %1810 = vmatpush3.bf16.xpose.msk.msra.mxu0 %vm2165_vm1, %v1808_v49 }
  0x5a   : > { %1858 = vmatpush3.bf16.xpose.msk.msra.mxu1 %vm2165_vm1, %v1856_v50 }
  0x60   : > { %1716 = vmatmul.mubr.msk.f32.vlgmr.msra.gmra.mrb[0].mxu0 %vm428_vm0, %v2138_v1 }
  0x61   : > { %1756 = vmatmul.mubr.msk.f32.vlgmr.msra.gmra.mrb[0].mxu1 %vm428_vm0, %v2138_v1  ;;  %1717 = vmatprep.mubr.msk.f32.mxu0 %vm428_vm0, %v401_v51  ;;  %v403_v1 = vld [vmem:[%s2457_s1 + $0x18] sm:$0xff] }
  0x62   : > { %1757 = vmatprep.mubr.msk.f32.mxu1 %vm428_vm0, %v401_v51 }
  0x64   : > { %1718 = vmatmul.mubr.msk.f32.gmra.mrb[2].mxu0 %vm428_vm0, %v401_v51 }
  0x65   : > { %1758 = vmatmul.mubr.msk.f32.gmra.mrb[2].mxu1 %vm428_vm0, %v401_v51  ;;  %1719 = vmatprep.mubr.msk.f32.mxu0 %vm428_vm0, %v402_v52  ;;  %v827_v51 = vld [vmem:[%s2459_s3] sm:$0xff] }
  0x66   : > { %1759 = vmatprep.mubr.msk.f32.mxu1 %vm428_vm0, %v402_v52 }
  0x68   : > { %1720 = vmatmul.mubr.msk.f32.gmra.mrb[4].mxu0 %vm428_vm0, %v402_v52 }
  0x69   : > { %1760 = vmatmul.mubr.msk.f32.gmra.mrb[4].mxu1 %vm428_vm0, %v402_v52  ;;  %1721 = vmatprep.mubr.msk.f32.mxu0 %vm428_vm0, %v403_v1  ;;  %v828_v52 = vld [vmem:[%s2459_s3 + $0x8] sm:$0xff] }
  0x6a   : > { %1761 = vmatprep.mubr.msk.f32.mxu1 %vm428_vm0, %v403_v1 }
  0x6c   : > { %1722 = vmatmul.mubr.msk.f32.gmra.mrb[6].mxu0 %vm428_vm0, %v403_v1 }
  0x6d   : > { %1762 = vmatmul.mubr.msk.f32.gmra.mrb[6].mxu1 %vm428_vm0, %v403_v1  ;;  %932 = vmatprep.mubr.f32.mxu0 %v2032_v7  ;;  %v829_v1 = vld [vmem:[%s2459_s3 + $0x10] sm:$0xff] }
  0x6e   : > { %1021 = vmatprep.mubr.f32.mxu1 %v2032_v7 }
  0x92   : > { %v411_v53 = vpop.permute.xlu0 %410  ;;  %v421_v4 = vpop.permute.xlu1 %420 }
  0x96   : > { %v416_v59 = vpop.permute.xlu0 %415  ;;  %v426_v27 = vpop.permute.xlu1 %425 }
 0x133   : > { %v699_v54 = vpop.f32.mrb[0].mxu0 }
 0x134   : > { %v788_v55 = vpop.f32.mrb[0].mxu1  ;;  %v701_v56 = vpop.f32.mrb[1].mxu0  ;;  %v700_v58 = vadd.f32 %v699_v54, %v411_v53 }
 0x135   : > { %v790_v57 = vpop.f32.mrb[1].mxu1  ;;  %v789_v60 = vadd.f32 %v788_v55, %v411_v53  ;;  %v702_v61 = vadd.f32 %v701_v56, %v411_v53 }
 0x136   : > { %v791_v63 = vadd.f32 %v790_v57, %v411_v53  ;;  %v811_v9 = vmax.f32 %v700_v58, 0.0  ;;  %v830_v53 = vld [vmem:[%s2459_s3 + $0x18] sm:$0xff]  ;;  %v838_v57 = vpop.permute.xlu0 %837 }
 0x137   : > { %v705_v62 = vpop.f32.mrb[2].mxu0  ;;  %v813_v12 = vmax.f32 %v789_v60, 0.0  ;;  %v812_v13 = vmax.f32 %v702_v61, 0.0  ;;  %v843_v60 = vpop.permute.xlu1 %842 }
 0x138   : > { %v706_v0 = vadd.f32 %v705_v62, %v416_v59  ;;  %v794_v2 = vpop.f32.mrb[2].mxu1  ;;  %v707_v3 = vpop.f32.mrb[3].mxu0  ;;  %v814_v17 = vmax.f32 %v791_v63, 0.0 }
 0x139   : > { %v795_v5 = vadd.f32 %v794_v2, %v416_v59  ;;  %v708_v6 = vadd.f32 %v707_v3, %v416_v59  ;;  %v796_v8 = vpop.f32.mrb[3].mxu1 }
 0x13a   : > { %v815_v10 = vmax.f32 %v706_v0, 0.0  ;;  %v797_v11 = vadd.f32 %v796_v8, %v416_v59 }
 0x13b   : > { %v817_v14 = vmax.f32 %v795_v5, 0.0  ;;  %v816_v15 = vmax.f32 %v708_v6, 0.0  ;;  %v711_v16 = vpop.f32.mrb[4].mxu0 }
 0x13c   : > { %v1861_v18 = vpack.c.bf16 %v815_v10, %v811_v9  ;;  %v818_v19 = vmax.f32 %v797_v11, 0.0  ;;  %v800_v20 = vpop.f32.mrb[4].mxu1  ;;  %v713_v21 = vpop.f32.mrb[5].mxu0  ;;  %v712_v26 = vadd.f32 %v711_v16, %v421_v4 }
 0x13d   : > { %v1869_v22 = vpack.c.bf16 %v817_v14, %v813_v12  ;;  %v1859_v23 = vpack.c.bf16 %v816_v15, %v812_v13  ;;  %v802_v24 = vpop.f32.mrb[5].mxu1  ;;  %v801_v28 = vadd.f32 %v800_v20, %v421_v4  ;;  %v714_v29 = vadd.f32 %v713_v21, %v421_v4 }
 0x13e   : > { %v1867_v25 = vpack.c.bf16 %v818_v19, %v814_v17  ;;  %v803_v31 = vadd.f32 %v802_v24, %v421_v4  ;;  %v819_v38 = vmax.f32 %v712_v26, 0.0 }
 0x13f   : > { %v717_v30 = vpop.f32.mrb[6].mxu0  ;;  %1860 = vmatprep.subr.bf16.mxu0 %v1859_v23  ;;  %v821_v41 = vmax.f32 %v801_v28, 0.0  ;;  %v820_v42 = vmax.f32 %v714_v29, 0.0  ;;  %v853_v28 = vpop.permute.xlu1 %852 }
 0x140   : > { %v718_v32 = vadd.f32 %v717_v30, %v426_v27  ;;  %v806_v33 = vpop.f32.mrb[6].mxu1  ;;  %1868 = vmatprep.subr.bf16.mxu1 %v1867_v25  ;;  %v719_v34 = vpop.f32.mrb[7].mxu0  ;;  %1862 = vmatpush1.bf16.msra.mxu0 %v1861_v18  ;;  %v822_v45 = vmax.f32 %v803_v31, 0.0 }
 0x141   : > { %v807_v35 = vadd.f32 %v806_v33, %v426_v27  ;;  %v720_v36 = vadd.f32 %v719_v34, %v426_v27  ;;  %v808_v37 = vpop.f32.mrb[7].mxu1  ;;  %1870 = vmatpush1.bf16.msra.mxu1 %v1869_v22  ;;  %v848_v22 = vpop.permute.xlu0 %847 }
 0x142   : > { %v823_v39 = vmax.f32 %v718_v32, 0.0  ;;  %v809_v40 = vadd.f32 %v808_v37, %v426_v27 }
 0x143   : > { %v825_v43 = vmax.f32 %v807_v35, 0.0  ;;  %v824_v44 = vmax.f32 %v720_v36, 0.0 }
 0x144   : > { %v1865_v46 = vpack.c.bf16 %v823_v39, %v819_v38  ;;  %v826_v47 = vmax.f32 %v809_v40, 0.0 }
 0x145   : > { %v1873_v48 = vpack.c.bf16 %v825_v43, %v821_v41  ;;  %v1863_v49 = vpack.c.bf16 %v824_v44, %v820_v42 }
 0x146   : > { %v1871_v50 = vpack.c.bf16 %v826_v47, %v822_v45 }
 0x147   : > { %1864 = vmatprep.subr.bf16.mxu0 %v1863_v49 }
 0x148   : > { %1872 = vmatprep.subr.bf16.mxu1 %v1871_v50  ;;  %1866 = vmatpush1.bf16.msra.mxu0 %v1865_v46 }
 0x149   : > { %1874 = vmatpush1.bf16.msra.mxu1 %v1873_v48 }
 0x14b   : > { %1659 = vmatmul.mubr.msk.f32.vlgmr.msra.gmra.mrb[8].mxu0 %vm855_vm2, %v827_v51 }
 0x14c   : > { %1663 = vmatmul.mubr.msk.f32.vlgmr.msra.gmra.mrb[8].mxu1 %vm855_vm2, %v827_v51  ;;  %938 = vmatprep.mubr.f32.mxu0 %v2032_v7 }
 0x14d   : > { %1027 = vmatprep.mubr.f32.mxu1 %v2032_v7 }
 0x14f   : > { %1660 = vmatmul.mubr.msk.f32.gmra.mrb[10].mxu0 %vm855_vm2, %v828_v52 }
 0x150   : > { %1664 = vmatmul.mubr.msk.f32.gmra.mrb[10].mxu1 %vm855_vm2, %v828_v52  ;;  %944 = vmatprep.mubr.f32.mxu0 %v2032_v7  ;;  %v1062_v52 = vld [vmem:[%s2461_s5] sm:$0xff] }
 0x151   : > { %1033 = vmatprep.mubr.f32.mxu1 %v2032_v7 }
 0x153   : > { %1661 = vmatmul.mubr.msk.f32.gmra.mrb[12].mxu0 %vm855_vm2, %v829_v1 }
 0x154   : > { %1665 = vmatmul.mubr.msk.f32.gmra.mrb[12].mxu1 %vm855_vm2, %v829_v1  ;;  %950 = vmatprep.mubr.f32.mxu0 %v2032_v7  ;;  %v1063_v1 = vld [vmem:[%s2461_s5 + $0x8] sm:$0xff] }
 0x155   : > { %1039 = vmatprep.mubr.f32.mxu1 %v2032_v7 }
 0x157   : > { %1662 = vmatmul.mubr.msk.f32.gmra.mrb[14].mxu0 %vm855_vm2, %v830_v53 }
 0x158   : > { %1666 = vmatmul.mubr.msk.f32.gmra.mrb[14].mxu1 %vm855_vm2, %v830_v53  ;;  %1166 = vmatprep.mubr.f32.mxu0 %v2032_v7  ;;  %v1064_v53 = vld [vmem:[%s2461_s5 + $0x10] sm:$0xff] }
 0x159   : > { %1255 = vmatprep.mubr.f32.mxu1 %v2032_v7 }
 0x21e   : > { %v934_v54 = vpop.f32.mrb[8].mxu0 }
 0x21f   : > { %v1023_v55 = vpop.f32.mrb[8].mxu1  ;;  %v936_v56 = vpop.f32.mrb[9].mxu0  ;;  %v935_v59 = vadd.f32 %v934_v54, %v838_v57  ;;  %v1065_v54 = vld [vmem:[%s2461_s5 + $0x18] sm:$0xff] }
 0x220   : > { %v1025_v58 = vpop.f32.mrb[9].mxu1  ;;  %v1024_v61 = vadd.f32 %v1023_v55, %v838_v57  ;;  %v937_v62 = vadd.f32 %v936_v56, %v838_v57 }
 0x221   : > { %v1026_v0 = vadd.f32 %v1025_v58, %v838_v57  ;;  %v1046_v9 = vmax.f32 %v935_v59, 0.0  ;;  %v1073_v58 = vpop.permute.xlu0 %1072 }
 0x222   : > { %v940_v63 = vpop.f32.mrb[10].mxu0  ;;  %v1048_v12 = vmax.f32 %v1024_v61, 0.0  ;;  %v1047_v13 = vmax.f32 %v937_v62, 0.0  ;;  %v1078_v61 = vpop.permute.xlu1 %1077 }
 0x223   : > { %v941_v2 = vadd.f32 %v940_v63, %v843_v60  ;;  %v1029_v3 = vpop.f32.mrb[10].mxu1  ;;  %v942_v4 = vpop.f32.mrb[11].mxu0  ;;  %v1049_v17 = vmax.f32 %v1026_v0, 0.0 }
 0x224   : > { %v1030_v5 = vadd.f32 %v1029_v3, %v843_v60  ;;  %v943_v6 = vadd.f32 %v942_v4, %v843_v60  ;;  %v1031_v8 = vpop.f32.mrb[11].mxu1 }
 0x225   : > { %v1050_v10 = vmax.f32 %v941_v2, 0.0  ;;  %v1032_v11 = vadd.f32 %v1031_v8, %v843_v60 }
 0x226   : > { %v1052_v14 = vmax.f32 %v1030_v5, 0.0  ;;  %v1051_v15 = vmax.f32 %v943_v6, 0.0  ;;  %v946_v16 = vpop.f32.mrb[12].mxu0 }
 0x227   : > { %v1877_v18 = vpack.c.bf16 %v1050_v10, %v1046_v9  ;;  %v1053_v19 = vmax.f32 %v1032_v11, 0.0  ;;  %v1035_v20 = vpop.f32.mrb[12].mxu1  ;;  %v948_v21 = vpop.f32.mrb[13].mxu0  ;;  %v947_v27 = vadd.f32 %v946_v16, %v848_v22 }
 0x228   : > { %v1885_v23 = vpack.c.bf16 %v1052_v14, %v1048_v12  ;;  %v1875_v24 = vpack.c.bf16 %v1051_v15, %v1047_v13  ;;  %v1037_v25 = vpop.f32.mrb[13].mxu1  ;;  %v1036_v29 = vadd.f32 %v1035_v20, %v848_v22  ;;  %v949_v30 = vadd.f32 %v948_v21, %v848_v22 }
 0x229   : > { %v1883_v26 = vpack.c.bf16 %v1053_v19, %v1049_v17  ;;  %v1038_v32 = vadd.f32 %v1037_v25, %v848_v22  ;;  %v1054_v39 = vmax.f32 %v947_v27, 0.0  ;;  %v1083_v22 = vpop.permute.xlu0 %1082 }
 0x22a   : > { %v952_v31 = vpop.f32.mrb[14].mxu0  ;;  %1876 = vmatprep.subr.bf16.mxu0 %v1875_v24  ;;  %v1056_v42 = vmax.f32 %v1036_v29, 0.0  ;;  %v1055_v43 = vmax.f32 %v949_v30, 0.0 }
 0x22b   : > { %v953_v33 = vadd.f32 %v952_v31, %v853_v28  ;;  %v1041_v34 = vpop.f32.mrb[14].mxu1  ;;  %1884 = vmatprep.subr.bf16.mxu1 %v1883_v26  ;;  %v954_v35 = vpop.f32.mrb[15].mxu0  ;;  %1878 = vmatpush1.bf16.msra.mxu0 %v1877_v18  ;;  %v1057_v46 = vmax.f32 %v1038_v32, 0.0 }
 0x22c   : > { %v1042_v36 = vadd.f32 %v1041_v34, %v853_v28  ;;  %v955_v37 = vadd.f32 %v954_v35, %v853_v28  ;;  %v1043_v38 = vpop.f32.mrb[15].mxu1  ;;  %1886 = vmatpush1.bf16.msra.mxu1 %v1885_v23 }
 0x22d   : > { %v1058_v40 = vmax.f32 %v953_v33, 0.0  ;;  %v1044_v41 = vadd.f32 %v1043_v38, %v853_v28  ;;  %v1088_v28 = vpop.permute.xlu1 %1087 }
 0x22e   : > { %v1060_v44 = vmax.f32 %v1042_v36, 0.0  ;;  %v1059_v45 = vmax.f32 %v955_v37, 0.0 }
 0x22f   : > { %v1881_v47 = vpack.c.bf16 %v1058_v40, %v1054_v39  ;;  %v1061_v48 = vmax.f32 %v1044_v41, 0.0 }
 0x230   : > { %v1889_v49 = vpack.c.bf16 %v1060_v44, %v1056_v42  ;;  %v1879_v50 = vpack.c.bf16 %v1059_v45, %v1055_v43 }
 0x231   : > { %v1887_v51 = vpack.c.bf16 %v1061_v48, %v1057_v46 }
 0x232   : > { %1880 = vmatprep.subr.bf16.mxu0 %v1879_v50 }
 0x233   : > { %1888 = vmatprep.subr.bf16.mxu1 %v1887_v51  ;;  %1882 = vmatpush1.bf16.msra.mxu0 %v1881_v47 }
 0x234   : > { %1890 = vmatpush1.bf16.msra.mxu1 %v1889_v49 }
 0x236   : > { %1667 = vmatmul.mubr.msk.f32.vlgmr.msra.gmra.mrb[16].mxu0 %vm855_vm2, %v1062_v52 }
 0x237   : > { %1671 = vmatmul.mubr.msk.f32.vlgmr.msra.gmra.mrb[16].mxu1 %vm855_vm2, %v1062_v52  ;;  %1172 = vmatprep.mubr.f32.mxu0 %v2032_v7  ;;  %v1296_v52 = vld [vmem:[%s2463_s7] sm:$0x1] }
 0x238   : > { %1261 = vmatprep.mubr.f32.mxu1 %v2032_v7 }
 0x23a   : > { %1668 = vmatmul.mubr.msk.f32.gmra.mrb[18].mxu0 %vm855_vm2, %v1063_v1 }
 0x23b   : > { %1672 = vmatmul.mubr.msk.f32.gmra.mrb[18].mxu1 %vm855_vm2, %v1063_v1  ;;  %1178 = vmatprep.mubr.f32.mxu0 %v2032_v7  ;;  %v1303_v1 = vlaneseq }
 0x23c   : > { %1267 = vmatprep.mubr.f32.mxu1 %v2032_v7 }
 0x23d   : > { %vm1503_vm3 = vcmp.lt.s32.totalorder %v1303_v1, 512 }
 0x23e   : > { %1669 = vmatmul.mubr.msk.f32.gmra.mrb[20].mxu0 %vm855_vm2, %v1064_v53 }
 0x23f   : > { %1673 = vmatmul.mubr.msk.f32.gmra.mrb[20].mxu1 %vm855_vm2, %v1064_v53  ;;  %1184 = vmatprep.mubr.f32.mxu0 %v2032_v7  ;;  %v1304_v53 = vshrl.u32 %v1303_v1, 7 }
 0x240   : > { %1273 = vmatprep.mubr.f32.mxu1 %v2032_v7 }
 0x242   : > { %1670 = vmatmul.mubr.msk.f32.gmra.mrb[22].mxu0 %vm855_vm2, %v1065_v54 }
 0x243   : > { %1674 = vmatmul.mubr.msk.f32.gmra.mrb[22].mxu1 %vm855_vm2, %v1065_v54  ;;  %1374 = vmatprep.mubr.f32.mxu0 %v2032_v7  ;;  %v1305_v54 = vsub.s32 0, %v1304_v53 }
 0x244   : > { %1445 = vmatprep.mubr.f32.mxu1 %v2032_v7 }
 0x309   : > { %v1168_v55 = vpop.f32.mrb[16].mxu0 }
 0x30a   : > { %v1257_v56 = vpop.f32.mrb[16].mxu1  ;;  %v1170_v57 = vpop.f32.mrb[17].mxu0  ;;  %v1169_v60 = vadd.f32 %v1168_v55, %v1073_v58 }
 0x30b   : > { %v1259_v59 = vpop.f32.mrb[17].mxu1  ;;  %v1258_v62 = vadd.f32 %v1257_v56, %v1073_v58  ;;  %v1171_v63 = vadd.f32 %v1170_v57, %v1073_v58  ;;  %v1301_v55 = vpop.permute.xlu0 %1300 }
 0x30c   : > { %v1260_v2 = vadd.f32 %v1259_v59, %v1073_v58  ;;  %v1280_v10 = vmax.f32 %v1169_v60, 0.0  ;;  %v1306_v56 = vrot.slane %v1301_v55, %v1305_v54 }
 0x30d   : > { %v1174_v0 = vpop.f32.mrb[18].mxu0  ;;  %v1282_v12 = vmax.f32 %v1258_v62, 0.0  ;;  %v1281_v13 = vmax.f32 %v1171_v63, 0.0 }
 0x30e   : > { %v1175_v3 = vadd.f32 %v1174_v0, %v1078_v61  ;;  %v1263_v4 = vpop.f32.mrb[18].mxu1  ;;  %v1176_v5 = vpop.f32.mrb[19].mxu0  ;;  %v1283_v17 = vmax.f32 %v1260_v2, 0.0 }
 0x30f   : > { %v1264_v6 = vadd.f32 %v1263_v4, %v1078_v61  ;;  %v1177_v8 = vadd.f32 %v1176_v5, %v1078_v61  ;;  %v1265_v9 = vpop.f32.mrb[19].mxu1 }
 0x310   : > { %v1284_v11 = vmax.f32 %v1175_v3, 0.0  ;;  %v1266_v7 = vadd.f32 %v1265_v9, %v1078_v61 }
 0x311   : > { %v1286_v14 = vmax.f32 %v1264_v6, 0.0  ;;  %v1285_v15 = vmax.f32 %v1177_v8, 0.0  ;;  %v1180_v16 = vpop.f32.mrb[20].mxu0 }
 0x312   : > { %v1893_v18 = vpack.c.bf16 %v1284_v11, %v1280_v10  ;;  %v1287_v19 = vmax.f32 %v1266_v7, 0.0  ;;  %v1269_v20 = vpop.f32.mrb[20].mxu1  ;;  %v1182_v21 = vpop.f32.mrb[21].mxu0  ;;  %v1181_v27 = vadd.f32 %v1180_v16, %v1083_v22 }
 0x313   : > { %v1901_v23 = vpack.c.bf16 %v1286_v14, %v1282_v12  ;;  %v1891_v24 = vpack.c.bf16 %v1285_v15, %v1281_v13  ;;  %v1271_v25 = vpop.f32.mrb[21].mxu1  ;;  %v1270_v29 = vadd.f32 %v1269_v20, %v1083_v22  ;;  %v1183_v30 = vadd.f32 %v1182_v21, %v1083_v22 }
 0x314   : > { %v1899_v26 = vpack.c.bf16 %v1287_v19, %v1283_v17  ;;  %v1272_v32 = vadd.f32 %v1271_v25, %v1083_v22  ;;  %v1288_v39 = vmax.f32 %v1181_v27, 0.0 }
 0x315   : > { %v1186_v31 = vpop.f32.mrb[22].mxu0  ;;  %1892 = vmatprep.subr.bf16.mxu0 %v1891_v24  ;;  %v1290_v42 = vmax.f32 %v1270_v29, 0.0  ;;  %v1289_v43 = vmax.f32 %v1183_v30, 0.0 }
 0x316   : > { %v1187_v33 = vadd.f32 %v1186_v31, %v1088_v28  ;;  %v1275_v34 = vpop.f32.mrb[22].mxu1  ;;  %1900 = vmatprep.subr.bf16.mxu1 %v1899_v26  ;;  %v1188_v35 = vpop.f32.mrb[23].mxu0  ;;  %1894 = vmatpush1.bf16.msra.mxu0 %v1893_v18  ;;  %v1291_v46 = vmax.f32 %v1272_v32, 0.0  ;;  %v2033_v18 = vmov 1966171168  }
 0x317   : > { %v1276_v36 = vadd.f32 %v1275_v34, %v1088_v28  ;;  %v1189_v37 = vadd.f32 %v1188_v35, %v1088_v28  ;;  %v1277_v38 = vpop.f32.mrb[23].mxu1  ;;  %1902 = vmatpush1.bf16.msra.mxu1 %v1901_v23  ;;  %v1479_v19 = vunpack.c.l.s4 %v2033_v18 }
 0x318   : > { %v1292_v40 = vmax.f32 %v1187_v33, 0.0  ;;  %v1278_v41 = vadd.f32 %v1277_v38, %v1088_v28 }
 0x319   : > { %v1294_v44 = vmax.f32 %v1276_v36, 0.0  ;;  %v1293_v45 = vmax.f32 %v1189_v37, 0.0  ;;  %v1480_v20 = vunpack.c.0.s8 %v1479_v19 }
 0x31a   : > { %v1897_v47 = vpack.c.bf16 %v1292_v40, %v1288_v39  ;;  %v1295_v48 = vmax.f32 %v1278_v41, 0.0 }
 0x31b   : > { %v1905_v49 = vpack.c.bf16 %v1294_v44, %v1290_v42  ;;  %v1895_v50 = vpack.c.bf16 %v1293_v45, %v1289_v43  ;;  %v1483_v23 = vsub.s32 %v1480_v20, %v1304_v53 }
 0x31c   : > { %v1903_v51 = vpack.c.bf16 %v1295_v48, %v1291_v46 }
 0x31d   : > { %1896 = vmatprep.subr.bf16.mxu0 %v1895_v50 }
 0x31e   : > { %1904 = vmatprep.subr.bf16.mxu1 %v1903_v51  ;;  %1898 = vmatpush1.bf16.msra.mxu0 %v1897_v47 }
 0x31f   : > { %1906 = vmatpush1.bf16.msra.mxu1 %v1905_v49 }
 0x321   : > { %1675 = vmatmul.mubr.msk.f32.vlgmr.msra.gmra.mrb[24].mxu0 %vm855_vm2, %v1296_v52 }
 0x322   : > { %1676 = vmatmul.mubr.msk.f32.vlgmr.msra.gmra.mrb[24].mxu1 %vm855_vm2, %v1296_v52 }
 0x3f4   : > { %v1376_v57 = vpop.f32.mrb[24].mxu0 }
 0x3f5   : > { %v1377_v58 = vadd.f32 %v1376_v57, %v1306_v56  ;;  %v1447_v59 = vpop.f32.mrb[24].mxu1  ;;  %v1378_v60 = vpop.f32.mrb[25].mxu0 }
 0x3f6   : > { %v1448_v61 = vadd.f32 %v1447_v59, %v1306_v56  ;;  %v1379_v62 = vadd.f32 %v1378_v60, %v1306_v56  ;;  %v1449_v63 = vpop.f32.mrb[25].mxu1 }
 0x3f7   : > { %v1452_v0 = vsub.f32 0.0, %v1377_v58  ;;  %v1450_v2 = vadd.f32 %v1449_v63, %v1306_v56 }
 0x3f8   : > { %v1454_v3 = vsub.f32 0.0, %v1448_v61  ;;  %v1453_v4 = vsub.f32 0.0, %v1379_v62 }
 0x3f9   : > { %v1456_v5 = vmul.f32 1.442695, %v1452_v0  ;;  %v1455_v6 = vsub.f32 0.0, %v1450_v2 }
 0x3fa   : > { %v1460_v8 = vmul.f32 1.442695, %v1454_v3  ;;  %v1458_v9 = vmul.f32 1.442695, %v1453_v4 }
 0x3fb   : > { %1951 = vpow2.f32 %v1456_v5  ;;  %v1462_v10 = vmul.f32 1.442695, %v1455_v6 }
 0x3fc   : > { %1953 = vpow2.f32 %v1460_v8 }
 0x3fd   : > { %1955 = vpow2.f32 %v1458_v9 }
 0x3fe   : > { %1957 = vpow2.f32 %v1462_v10 }
 0x405   : > { %v1952_v11 = vpop.eup %1951 }
 0x406   : > { %v1954_v7 = vpop.eup %1953  ;;  %v1464_v12 = vadd.f32 1.0, %v1952_v11 }
 0x407   : > { %v1956_v13 = vpop.eup %1955  ;;  %v1466_v14 = vadd.f32 1.0, %v1954_v7 }
 0x408   : > { %v1958_v15 = vpop.eup %1957  ;;  %1959 = vrcp.f32 %v1464_v12  ;;  %v1465_v16 = vadd.f32 1.0, %v1956_v13 }
 0x409   : > { %1961 = vrcp.f32 %v1466_v14  ;;  %v1467_v17 = vadd.f32 1.0, %v1958_v15 }
 0x40a   : > { %1963 = vrcp.f32 %v1465_v16 }
 0x40b   : > { %1965 = vrcp.f32 %v1467_v17 }
 0x412   : > { %v1960_v21 = vpop.eup %1959 }
 0x413   : > { %v1962_v22 = vpop.eup %1961 }
 0x414   : > { %v1964_v24 = vpop.eup %1963 }
 0x415   : > { %v1966_v25 = vpop.eup %1965  ;;  %v1476_v26 = vcombine.low %v1960_v21, %v1964_v24 }
 0x416   : > { %v1477_v27 = vcombine.low %v1962_v22, %v1966_v25 }
 0x417   : > { %v1484_v28 = vrot.slane %v1476_v26, %v1483_v23 }
 0x418   : > { %v1491_v29 = vrot.slane %v1477_v27, %v1483_v23 }
 0x41a   : > { %v1492_v30 = vcombine.low %v1484_v28, %v1491_v29 }
 0x41c   : > { %v1499_v31 = vrot.slane %v1492_v30, %v1483_v23 }
 0x41e   : > { %1505 = vst.msk [vmem:[%s328_s29] sm:$0xf] %vm1503_vm3, %v1499_v31 }
 0x41f   : > { %1980 = shalt.err (!%p1977_p3)
}
 0x420   : > { %s1981_s22 = scalar_lea.hbm %s2414_s8, 64  ;;  %s1985_s28 = scalar_lea.hbm %s2465_s9, 128 }
 0x421   : > { %p1982_p4 = scmp.ne.s32.totalorder %s2414_s8, %s1981_s22  ;;  %p1986_p9 = scmp.lt.u32.totalorder %s2414_s8, %s2465_s9 }
 0x422   : > { %p1987_p10 = scmp.lt.u32.totalorder %s1985_s28, %s1981_s22  ;;  %p1989_p12 = scmp.lt.u32.totalorder %s1981_s22, %s2414_s8 }
 0x423   : > { %p1983_p7 = pnand %p1982_p4, %p2123_p5 }
 0x424   : > { %p1988_p11 = por %p1987_p10, %p1986_p9 }
 0x425   : > { %p1984_p8 = pneg %p1983_p7 }
 0x426   : > { %p1990_p13 = por %p1989_p12, %p1988_p11 }
 0x428   : > { %p1991_p0 = pnand %p1990_p13, %p1984_p8 }
 0x42a   : > { %1994 = shalt.err (!%p1991_p0)
}
 0x42b   : > { %1907 = dma.vmem_to_hbm [thread:$0]  (%p2123_p5), %s2416_s30, 64, %s2414_s8, %s1507_s15  }
 0x42c PF: > { %p1913_p1 = scmp.ge.s32.totalorder %s2029_s14, 2  ;;  %s1533_s10 = sand.u32 1, %s2017_s11  }
 0x42d   : > { %s1534_s17 = scalar_lea.sflag [#allocation4], %s1533_s10 }
 0x42e   : > { %p1910_p2 = pnand %p1913_p1, %p2127_p6 }
 0x430   : > { %2012 = dma.done.wait (!%p1910_p2), %s1534_s17, 64  }
 0x431   : > { %2014 = vsyncadd (!%p1910_p2), %s1534_s17, 4294967232  ;;  %p21_p3 = scmp.ge.s32.totalorder %s2111_s16, 4   ;;  %s2470_s11 = smov %s2021_s12 }
 0x432   : > { %s2471_s12 = smov %s2025_s13  ;;  %s2472_s13 = smov %s2121_s19 }
 0x433   : > { %s2473_s14 = smov %s2111_s16  ;;  %23 = sbr.rel (!%p21_p3) target bundleno = 6 (0x6), region = 91 }
 0x43a   :  { %1539 = vsyncpa [#allocation4], 1 }
 0x43b   :  { %1541 = vsyncpa [#allocation4 + $0x1], 1 }

</bundles_post_ra>
